<compile_context>
chip_gen: v6e
topology: v6e:2x2x1
jax: 0.10.0
libtpu: 0.0.40
codegen_flags: <defaults>
</compile_context>

<pallas_src>
import functools

import jax
import jax.numpy as jnp
from jax.experimental import pallas as pl
from jax.experimental.pallas import tpu as pltpu

EPS = 1e-5  # PyTorch InstanceNorm2d default eps


def _round_up(x, m):
    return ((x + m - 1) // m) * m


def unet_down_kernel(p_ref, w_ref, o_ref, ssum_ref, ssq_ref, *,
                     normalize, inv_true_s, ts, num_s):
    # p_ref:    (1, K, tS)   bf16 im2col patch tile (one batch element, one S tile)
    # w_ref:    (tCo, K)     bf16 flattened conv weights for this Cout tile
    # o_ref:    (1, tCo, S_p) f32 output block, resident in VMEM across the S axis
    # ssum_ref: (tCo, 1)     f32 running per-channel sum      (InstanceNorm stats)
    # ssq_ref:  (tCo, 1)     f32 running per-channel sum(x^2) (InstanceNorm stats)
    s_idx = pl.program_id(2)

    if normalize:
        @pl.when(s_idx == 0)
        def _():
            ssum_ref[...] = jnp.zeros_like(ssum_ref)
            ssq_ref[...] = jnp.zeros_like(ssq_ref)

    # Conv tile as one MXU matmul: bf16 operands, f32 accumulation.
    y = jnp.dot(w_ref[...], p_ref[0], preferred_element_type=jnp.float32)  # (tCo, tS)

    off = pl.multiple_of(s_idx * ts, 128)

    if normalize:
        # Per-tile stats: lane reductions ride the XLU slot while the kernel is
        # HBM-bound; zero-padded spatial lanes contribute 0 to both sums, and we
        # divide by the TRUE S later, so stats are exact.
        ssum_ref[...] += jnp.sum(y, axis=-1, keepdims=True)
        ssq_ref[...] += jnp.sum(y * y, axis=-1, keepdims=True)
        o_ref[0, :, pl.ds(off, ts)] = y.astype(o_ref.dtype)

        # Finalize on the last S tile: normalize + ReLU the resident block,
        # tile-by-tile with static slices (no monolithic read pass / temporaries).
        @pl.when(s_idx == pl.num_programs(2) - 1)
        def _():
            mean = ssum_ref[...] * inv_true_s                               # (tCo, 1)
            var = jnp.maximum(ssq_ref[...] * inv_true_s - mean * mean, 0.0)
            inv_std = jax.lax.rsqrt(var + EPS)
            scale = inv_std
            shift = -mean * inv_std
            for i in range(num_s):                 # static unroll, static slices
                sl = pl.ds(i * ts, ts)
                blk = o_ref[0, :, sl]
                o_ref[0, :, sl] = jnp.maximum(blk * scale + shift,
                                              0.0).astype(o_ref.dtype)
    else:
        # No InstanceNorm: fuse ReLU directly into the tile store.
        o_ref[0, :, pl.ds(off, ts)] = jnp.maximum(y, 0.0).astype(o_ref.dtype)


def unet_down(x, weight, *, normalize=True):
    """x: (N, C_in, H, W) f32, weight: (C_out, C_in, 4, 4) f32 -> (N, C_out, H/2, W/2)."""
    N, Cin, H, W = x.shape
    Cout = weight.shape[0]
    kh = kw = 4
    stride, pad = 2, 1
    Ho = (H + 2 * pad - kh) // stride + 1
    Wo = (W + 2 * pad - kw) // stride + 1
    S = Ho * Wo
    K = Cin * kh * kw            # always a multiple of 16 -> no K padding needed

    # ---------------- hardware-aware VMEM budgets ----------------
    try:
        vmem_cap = int(pltpu.get_tpu_info().vmem_capacity_bytes)
    except Exception:
        vmem_cap = 64 * 1024 * 1024          # conservative fallback (covers v7x)
    big_vmem = vmem_cap >= 100 * 1024 * 1024  # v5e / v6e: 128 MiB; v7x: 64 MiB
    patch_cap = (8 if big_vmem else 4) * 1024 * 1024
    out_cap = (24 if big_vmem else 10) * 1024 * 1024
    ts_max = 4096 if big_vmem else 2048
    vmem_limit = (96 if big_vmem else 48) * 1024 * 1024

    # ---------------- spatial (lane) tiling: tS, S_p always multiples of 128 ----
    ts_cap = max(128, (patch_cap // (K * 2)) // 128 * 128)
    ts_target = min(ts_max, ts_cap)
    S_128 = _round_up(S, 128)
    if S_128 <= ts_target:
        tS = S_p = S_128
    else:
        tS = ts_target
        S_p = _round_up(S, tS)
    num_s = S_p // tS

    # ---------------- Cout (sublane) tiling: resident (tCo, S_p) f32 block ------
    Cout_p = _round_up(Cout, 8)
    if Cout_p * S_p * 4 <= out_cap:
        tCo = Cout_p                          # num_co == 1: patch stream read once
    else:
        tCo = max(8, min(512, (out_cap // (S_p * 4)) // 8 * 8))
        Cout_p = _round_up(Cout, tCo)
    num_co = Cout_p // tCo

    # v7x has two TensorCores: ensure the parallel axes carry >= 2 units of work.
    if N * num_co == 1 and Cout > 8:
        Cout_p = _round_up(Cout, 16)
        tCo = Cout_p // 2
        num_co = 2

    # ---------------- glue: im2col -> (N, K, S) bf16, zero-padded on lanes ------
    xp = jnp.pad(x, ((0, 0), (0, 0), (pad, pad), (pad, pad)))
    cols = []
    for i in range(kh):
        for j in range(kw):
            cols.append(xp[:, :, i:i + stride * Ho:stride, j:j + stride * Wo:stride])
    # K-axis ordering = (C_in, kh, kw) -- matches weight.reshape(Cout, K)
    patches = jnp.stack(cols, axis=2).reshape(N, K, S).astype(jnp.bfloat16)
    patches = jnp.pad(patches, ((0, 0), (0, 0), (0, S_p - S)))       # (N, K, S_p)

    w_mat = weight.reshape(Cout, K).astype(jnp.bfloat16)
    w_mat = jnp.pad(w_mat, ((0, Cout_p - Cout), (0, 0)))             # (Cout_p, K)

    # ---------------- Pallas kernel ----------------
    kern = functools.partial(unet_down_kernel,
                             normalize=normalize,
                             inv_true_s=1.0 / float(S),
                             ts=tS,
                             num_s=num_s)

    bytes_accessed = (N * num_co * K * S_p * 2        # bf16 patches (re-read per Cout tile)
                      + N * num_co * tCo * K * 2      # bf16 weights
                      + N * Cout_p * S_p * 4)         # f32 output writeback
    cost = pl.CostEstimate(flops=2 * N * Cout_p * K * S_p,
                           transcendentals=(N * Cout_p) if normalize else 0,
                           bytes_accessed=bytes_accessed)

    out = pl.pallas_call(
        kern,
        out_shape=jax.ShapeDtypeStruct((N, Cout_p, S_p), x.dtype),
        grid=(N, num_co, num_s),
        in_specs=[
            pl.BlockSpec((1, K, tS), lambda n, co, s: (n, 0, s)),
            pl.BlockSpec((tCo, K), lambda n, co, s: (co, 0)),
        ],
        out_specs=pl.BlockSpec((1, tCo, S_p), lambda n, co, s: (n, co, 0)),
        scratch_shapes=[pltpu.VMEM((tCo, 1), jnp.float32),   # running sum
                        pltpu.VMEM((tCo, 1), jnp.float32)],  # running sum of squares
        compiler_params=pltpu.CompilerParams(
            dimension_semantics=("parallel", "parallel", "arbitrary"),
            vmem_limit_bytes=vmem_limit,
        ),
        cost_estimate=cost,
    )(patches, w_mat)

    # Strip channel / spatial padding; output is already NCHW-ordered (no transpose).
    return out[:, :Cout, :S].reshape(N, Cout, Ho, Wo)


def reference(x, weight, *, normalize=True):
    """Pure-JAX f32 reference matching the PyTorch forward."""
    y = jax.lax.conv_general_dilated(
        x, weight, window_strides=(2, 2), padding=((1, 1), (1, 1)),
        dimension_numbers=('NCHW', 'OIHW', 'NCHW'))
    if normalize:
        m = y.mean(axis=(2, 3), keepdims=True)
        v = y.var(axis=(2, 3), keepdims=True)
        y = (y - m) / jnp.sqrt(v + EPS)
    return jnp.maximum(y, 0.0)


if __name__ == "__main__":
    key = jax.random.PRNGKey(0)
    kx, kw_ = jax.random.split(key)

    # small shapes consistent with the module: NCHW input, Conv2d(in=4, out=8, 4, 2, 1)
    N, Cin, H, W = 2, 4, 16, 16
    Cout = 8

    x = jax.random.normal(kx, (N, Cin, H, W), dtype=jnp.float32)

    # deterministic weight init (mimics PyTorch's default U(-1/sqrt(fan_in), +1/sqrt(fan_in)))
    fan_in = Cin * 4 * 4
    bound = 1.0 / (fan_in ** 0.5)
    weight = jax.random.uniform(kw_, (Cout, Cin, 4, 4), jnp.float32, -bound, bound)

    # normalize=True path (Conv -> InstanceNorm -> ReLU)
    out = jax.block_until_ready(unet_down(x, weight, normalize=True))
    ref = reference(x, weight, normalize=True)
    assert out.shape == (N, Cout, H // 2, W // 2), out.shape
    # bf16 matmul operands (f32 accumulate) vs f32 reference -> relaxed tolerance
    assert jnp.allclose(out, ref, atol=5e-2, rtol=5e-2), "mismatch vs reference (normalize=True)"

    # normalize=False path (Conv -> ReLU)
    out_nn = jax.block_until_ready(unet_down(x, weight, normalize=False))
    ref_nn = reference(x, weight, normalize=False)
    assert jnp.allclose(out_nn, ref_nn, atol=5e-2, rtol=5e-2), "mismatch vs reference (normalize=False)"

    print("KERNEL_OK")
</pallas_src>

<mosaic_0001>
module attributes {stable_mosaic.version = 11 : i64} {
  func.func @unet_down_kernel(%arg0: i32, %arg1: i32, %arg2: i32, %arg3: memref<1x64x128xbf16, #tpu.memory_space<vmem>>, %arg4: memref<8x64xbf16, #tpu.memory_space<vmem>>, %arg5: memref<1x8x128xf32, #tpu.memory_space<vmem>>, %arg6: memref<8x1xf32, #tpu.memory_space<vmem>>, %arg7: memref<8x1xf32, #tpu.memory_space<vmem>>) attributes {dimension_semantics = [#tpu.dimension_semantics<parallel>, #tpu.dimension_semantics<parallel>, #tpu.dimension_semantics<arbitrary>], iteration_bounds = array<i64: 2, 1, 1>, scalar_prefetch = 0 : i64, scratch_operands = 2 : i64, tpu.core_type = #tpu.core_type<tc>, window_params = [{transform_indices = @transform_0, window_bounds = array<i64: 1, 64, 128>}, {transform_indices = @transform_1, window_bounds = array<i64: 8, 64>}, {transform_indices = @transform_2, window_bounds = array<i64: 1, 8, 128>}]} {
    %c0_i32 = arith.constant 0 : i32
    %0 = arith.cmpi eq, %arg2, %c0_i32 : i32
    %1 = arith.extui %0 : i1 to i32
    %c0_i32_0 = arith.constant 0 : i32
    %2 = arith.cmpi ne, %1, %c0_i32_0 : i32
    scf.if %2 {
      %cst_19 = arith.constant 0.000000e+00 : f32
      %27 = vector.broadcast %cst_19 : f32 to vector<8x1xf32>
      %c0_20 = arith.constant 0 : index
      %c0_21 = arith.constant 0 : index
      %28 = vector.load %arg6[%c0_20, %c0_21] : memref<8x1xf32, #tpu.memory_space<vmem>>, vector<8x1xf32>
      tpu.vector_store %arg6[%c0_20, %c0_21], %27 {strides = array<i32>} : memref<8x1xf32, #tpu.memory_space<vmem>>, vector<8x1xf32>,
      %cst_22 = arith.constant 0.000000e+00 : f32
      %29 = vector.broadcast %cst_22 : f32 to vector<8x1xf32>
      %c0_23 = arith.constant 0 : index
      %c0_24 = arith.constant 0 : index
      %30 = vector.load %arg7[%c0_23, %c0_24] : memref<8x1xf32, #tpu.memory_space<vmem>>, vector<8x1xf32>
      tpu.vector_store %arg7[%c0_23, %c0_24], %29 {strides = array<i32>} : memref<8x1xf32, #tpu.memory_space<vmem>>, vector<8x1xf32>,
    } else {
    }
    %c0 = arith.constant 0 : index
    %c0_1 = arith.constant 0 : index
    %3 = vector.load %arg4[%c0, %c0_1] : memref<8x64xbf16, #tpu.memory_space<vmem>>, vector<8x64xbf16>
    %c0_2 = arith.constant 0 : index
    %c0_3 = arith.constant 0 : index
    %c0_4 = arith.constant 0 : index
    %4 = vector.load %arg3[%c0_2, %c0_3, %c0_4] : memref<1x64x128xbf16, #tpu.memory_space<vmem>>, vector<1x64x128xbf16>
    %5 = vector.shape_cast %4 : vector<1x64x128xbf16> to vector<64x128xbf16>
    %cst = arith.constant dense<0.000000e+00> : vector<8x128xf32>
    %6 = tpu.matmul %3, %5, %cst {dimension_numbers = #tpu.dot_dimension_numbers<[1], [0], [0], [1], [0, 0, 1, 1], [], []>} : vector<8x64xbf16>, vector<64x128xbf16>, vector<8x128xf32> -> vector<8x128xf32>
    %c128_i32 = arith.constant 128 : i32
    %7 = arith.muli %arg2, %c128_i32 : i32
    %8 = tpu.assume_multiple %7, 128 : i32
    %c0_5 = arith.constant 0 : index
    %c0_6 = arith.constant 0 : index
    %9 = vector.load %arg6[%c0_5, %c0_6] : memref<8x1xf32, #tpu.memory_space<vmem>>, vector<8x1xf32>
    %cst_7 = arith.constant dense<0.000000e+00> : vector<8xf32>
    %10 = vector.multi_reduction <add>, %6, %cst_7 [1] : vector<8x128xf32> to vector<8xf32>
    %11 = vector.shape_cast %10 : vector<8xf32> to vector<8x1xf32>
    %12 = arith.addf %9, %11 : vector<8x1xf32>
    %c0_8 = arith.constant 0 : index
    %c0_9 = arith.constant 0 : index
    %13 = vector.load %arg6[%c0_8, %c0_9] : memref<8x1xf32, #tpu.memory_space<vmem>>, vector<8x1xf32>
    tpu.vector_store %arg6[%c0_8, %c0_9], %12 {strides = array<i32>} : memref<8x1xf32, #tpu.memory_space<vmem>>, vector<8x1xf32>,
    %c0_10 = arith.constant 0 : index
    %c0_11 = arith.constant 0 : index
    %14 = vector.load %arg7[%c0_10, %c0_11] : memref<8x1xf32, #tpu.memory_space<vmem>>, vector<8x1xf32>
    %15 = arith.mulf %6, %6 : vector<8x128xf32>
    %cst_12 = arith.constant dense<0.000000e+00> : vector<8xf32>
    %16 = vector.multi_reduction <add>, %15, %cst_12 [1] : vector<8x128xf32> to vector<8xf32>
    %17 = vector.shape_cast %16 : vector<8xf32> to vector<8x1xf32>
    %18 = arith.addf %14, %17 : vector<8x1xf32>
    %c0_13 = arith.constant 0 : index
    %c0_14 = arith.constant 0 : index
    %19 = vector.load %arg7[%c0_13, %c0_14] : memref<8x1xf32, #tpu.memory_space<vmem>>, vector<8x1xf32>
    tpu.vector_store %arg7[%c0_13, %c0_14], %18 {strides = array<i32>} : memref<8x1xf32, #tpu.memory_space<vmem>>, vector<8x1xf32>,
    %c0_15 = arith.constant 0 : index
    %c0_16 = arith.constant 0 : index
    %20 = arith.index_cast %8 : i32 to index
    %21 = vector.load %arg5[%c0_15, %c0_16, %20] : memref<1x8x128xf32, #tpu.memory_space<vmem>>, vector<1x8x128xf32>
    %22 = vector.shape_cast %21 : vector<1x8x128xf32> to vector<8x128xf32>
    %23 = vector.shape_cast %6 : vector<8x128xf32> to vector<1x8x128xf32>
    tpu.vector_store %arg5[%c0_15, %c0_16, %20], %23 {strides = array<i32>} : memref<1x8x128xf32, #tpu.memory_space<vmem>>, vector<1x8x128xf32>,
    %c0_i32_17 = arith.constant 0 : i32
    %24 = arith.cmpi eq, %arg2, %c0_i32_17 : i32
    %25 = arith.extui %24 : i1 to i32
    %c0_i32_18 = arith.constant 0 : i32
    %26 = arith.cmpi ne, %25, %c0_i32_18 : i32
    scf.if %26 {
      %c0_19 = arith.constant 0 : index
      %c0_20 = arith.constant 0 : index
      %27 = vector.load %arg6[%c0_19, %c0_20] : memref<8x1xf32, #tpu.memory_space<vmem>>, vector<8x1xf32>
      %cst_21 = arith.constant 1.562500e-02 : f32
      %28 = vector.broadcast %cst_21 : f32 to vector<8x1xf32>
      %29 = arith.mulf %27, %28 : vector<8x1xf32>
      %c0_22 = arith.constant 0 : index
      %c0_23 = arith.constant 0 : index
      %30 = vector.load %arg7[%c0_22, %c0_23] : memref<8x1xf32, #tpu.memory_space<vmem>>, vector<8x1xf32>
      %cst_24 = arith.constant 1.562500e-02 : f32
      %31 = vector.broadcast %cst_24 : f32 to vector<8x1xf32>
      %32 = arith.mulf %30, %31 : vector<8x1xf32>
      %33 = arith.mulf %29, %29 : vector<8x1xf32>
      %34 = arith.subf %32, %33 : vector<8x1xf32>
      %cst_25 = arith.constant 0.000000e+00 : f32
      %35 = vector.broadcast %cst_25 : f32 to vector<8x1xf32>
      %36 = arith.maximumf %34, %35 : vector<8x1xf32>
      %cst_26 = arith.constant 9.99999974E-6 : f32
      %37 = vector.broadcast %cst_26 : f32 to vector<8x1xf32>
      %38 = arith.addf %36, %37 : vector<8x1xf32>
      %39 = math.rsqrt %38 : vector<8x1xf32>
      %cst_27 = arith.constant 0.000000e+00 : f32
      %40 = vector.broadcast %cst_27 : f32 to vector<8x1xf32>
      %41 = arith.subf %40, %29 : vector<8x1xf32>
      %42 = arith.mulf %41, %39 : vector<8x1xf32>
      %c0_28 = arith.constant 0 : index
      %c0_29 = arith.constant 0 : index
      %c0_30 = arith.constant 0 : index
      %43 = vector.load %arg5[%c0_28, %c0_29, %c0_30] : memref<1x8x128xf32, #tpu.memory_space<vmem>>, vector<1x8x128xf32>
      %44 = vector.shape_cast %43 : vector<1x8x128xf32> to vector<8x128xf32>
      %45 = vector.broadcast %39 : vector<8x1xf32> to vector<8x128xf32>
      %46 = arith.mulf %44, %45 : vector<8x128xf32>
      %47 = vector.broadcast %42 : vector<8x1xf32> to vector<8x128xf32>
      %48 = arith.addf %46, %47 : vector<8x128xf32>
      %cst_31 = arith.constant 0.000000e+00 : f32
      %49 = vector.broadcast %cst_31 : f32 to vector<8x128xf32>
      %50 = arith.maximumf %48, %49 : vector<8x128xf32>
      %c0_32 = arith.constant 0 : index
      %c0_33 = arith.constant 0 : index
      %c0_34 = arith.constant 0 : index
      %51 = vector.load %arg5[%c0_32, %c0_33, %c0_34] : memref<1x8x128xf32, #tpu.memory_space<vmem>>, vector<1x8x128xf32>
      %52 = vector.shape_cast %51 : vector<1x8x128xf32> to vector<8x128xf32>
      %53 = vector.shape_cast %50 : vector<8x128xf32> to vector<1x8x128xf32>
      tpu.vector_store %arg5[%c0_32, %c0_33, %c0_34], %53 {strides = array<i32>} : memref<1x8x128xf32, #tpu.memory_space<vmem>>, vector<1x8x128xf32>,
    } else {
    }
    return
  }
  func.func @transform_0(%arg0: i32, %arg1: i32, %arg2: i32) -> (i32, i32, i32) {
    %c0_i32 = arith.constant 0 : i32
    %c0_i32_0 = arith.constant 0 : i32
    return %arg0, %c0_i32, %arg2 : i32, i32, i32
  }
  func.func @transform_1(%arg0: i32, %arg1: i32, %arg2: i32) -> (i32, i32) {
    %c0_i32 = arith.constant 0 : i32
    %c0_i32_0 = arith.constant 0 : i32
    return %arg1, %c0_i32 : i32, i32
  }
  func.func @transform_2(%arg0: i32, %arg1: i32, %arg2: i32) -> (i32, i32, i32) {
    %c0_i32 = arith.constant 0 : i32
    %c0_i32_0 = arith.constant 0 : i32
    return %arg0, %arg1, %c0_i32 : i32, i32, i32
  }
}

</mosaic_0001>

<bundles_post_ra>
// kernel: tpu_custom_call.1
= control target key start
LH: loop header
LB: loop body
LE: loop exit
PB: predicated region body
PF: predicated region fallthrough
CT: control target
= control target key end

     0   :  { %7 = vsyncpa [#allocation5], 0  ;;  %s905_s0 = inlined_call_operand.hbm [shape: bf16[2,64,128], index: 0, kind: input, shape index: {}]   ;;  %s906_s1 = inlined_call_operand.hbm [shape: bf16[8,64], index: 1, kind: input, shape index: {}]   ;;  %s907_s2 = inlined_call_operand.hbm [shape: f32[2,8,128], index: 2, kind: output, shape index: {}]  }
   0x1   :  { %9 = vsyncpa [#allocation5 + $0x1], 0 }
   0x2   :  { %10 = vsyncpa [#allocation8], 0 }
   0x3   :  { %11 = vsyncpa [#allocation6], 0 }
   0x4   :  { %13 = vsyncpa [#allocation6 + $0x1], 0  ;;  %s737_s9 = smov 0   ;;  %s739_s10 = smov 0  }
   0x5   :  { %s741_s11 = smov 0   ;;  %s743_s12 = smov 0  }
   0x6   :  { %s745_s13 = smov 0   ;;  %s747_s14 = smov 0  }
   0x7 LB: > { %s449_s15 = sadd.s32 4294967295, %s712_s14   ;;  %s450_s16 = sadd.s32 4294967294, %s712_s14   ;;  %s712_s14 = sphi %s747_s14, %s19_s14   ;;  %s708_s13 = sphi %s745_s13, %s926_s13   ;;  %s704_s12 = sphi %s743_s12, %s925_s12   ;;  %s700_s11 = sphi %s741_s11, %s924_s11   ;;  %s696_s10 = sphi %s739_s10, %s923_s10   ;;  %s692_s9 = sphi %s737_s9, %s922_s9  }
   0x8   : > { %s47_s17 = sadd.s32 1, %s700_s11  ;;  %p54_p0 = scmp.ne.s32.totalorder %s700_s11, %s696_s10 }
   0x9   : > { %p55_p1 = scmp.eq.s32.totalorder %s712_s14, 0  ;;  %p60_p2 = scmp.ne.s32.totalorder %s696_s10, %s692_s9 }
   0xa   : > { %p775_p3 = scmp.eq.s32.totalorder %s449_s15, 0  ;;  %p112_p4 = scmp.eq.s32.totalorder %s449_s15, 1 }
   0xb   : > { %p779_p5 = por %p55_p1, %p54_p0  ;;  %p118_p6 = scmp.eq.s32.totalorder %s450_s16, 1 }
   0xc   : > { %p785_p7 = por %p775_p3, %p60_p2  ;;  %p789_p8 = por %p112_p4, %p54_p0 }
   0xd   : > { %p793_p9 = por %p118_p6, %p60_p2  ;;  %p451_p10 = scmp.ge.s32.totalorder %s712_s14, 1 }
   0xe   : > { %s912_s20 = scalar_select %p785_p7, 1, 0 }
   0xf   : > { %s913_s21 = scalar_select %p789_p8, 1, 0 }
  0x10   : > { %s914_s22 = scalar_select %p793_p9, 1, 0 }
  0x11   : > { %p125_p11 = scmp.lt.s32.totalorder %s712_s14, 3  ;;  %s714_s24 = smov [#allocation7]  }
  0x12   : > { %s140_s25 = sshll.u32 %s714_s24, 4  ;;  %p509_p1 = scmp.lt.s32.totalorder %s712_s14, 2  ;;  %s141_s25 = int_to_ptr.vmem [resolvable:$true] %s140_s25 }
  0x13   : > { %p800_p13 = pnand %p451_p10, %p125_p11  ;;  %s38_s28 = sadd.s32 1, %s708_s13 }
  0x14   : > { %p809_p4 = pnand %p509_p1, %p779_p5  ;;  %p40_p6 = scmp.ge.s32.totalorder %s38_s28, 2 }
  0x15   : > { %p496_p0 = pneg %p800_p13  ;;  %s151_s29 = sand.u32 1, %s700_s11  }
  0x16   : > { %s585_s30 = scalar_lea.vmem %s141_s25, 64  ;;  %p593_p8 = scmp.lt.s32.totalorder %s141_s25, %s141_s25 }
  0x17   : > { %p815_p2 = pnand %p496_p0, %p775_p3  ;;  %p586_p11 = scmp.ne.s32.totalorder %s141_s25, %s585_s30 }
  0x18   : > { %p594_p5 = scmp.lt.s32.totalorder %s585_s30, %s585_s30 }
  0x19   : > { %p576_p10 = pneg %p815_p2 }
  0x1a   : > { %p595_p1 = por %p594_p5, %p593_p8 }
  0x1b   : > { %p588_p12 = pnand %p586_p11, %p576_p10 }
  0x1d   : > { %p589_p9 = pneg %p588_p12 }
  0x1f   : > { %p596_p7 = pnand %p595_p1, %p589_p9 }
  0x21   : > { %599 = shalt.err (!%p596_p7)
}
  0x22   : > { %499 = dma.hbm_to_vmem [thread:$0]  (!%p815_p2), %s906_s1, 64, %s141_s25, [#allocation8]  }
  0x23   : > { %s928_s28 = smov (%p40_p6, %s38_s28), 0  ;;  %s454_s5 = sshll.u32 %s151_s29, 5 }
  0x24   : > { %s42_s6 = ssub.s32 %s708_s13, %s928_s28  ;;  %s470_s7 = sshll.u32 %s708_s13, 9 }
  0x25   : > { %p45_p12 = scmp.eq.s32.totalorder %s42_s6, 0  ;;  %s162_s16 = scalar_lea.hbm %s905_s0, %s470_s7 }
  0x26   : > { %s155_s19 = scalar_lea.vmem [#allocation4], %s454_s5  ;;  %s152_s30 = scalar_lea.sflag [#allocation5], %s151_s29 }
  0x27   : > { %s163_s24 = sshll.u32 %s155_s19, 4  ;;  %p602_p7 = pneg %p809_p4  ;;  %s164_s24 = int_to_ptr.vmem [resolvable:$true] %s163_s24 }
  0x28   : > { %s839_s27 = scalar_select %p45_p12, %s700_s11, %s47_s17  }
  0x29   : > { %s613_s25 = scalar_lea.vmem %s164_s24, 512  ;;  %s715_s3 = smov [#allocation4]  }
  0x2a   : > { %p614_p8 = scmp.ne.s32.totalorder %s164_s24, %s613_s25  ;;  %s618_s4 = sshll.u32 %s715_s3, 4  ;;  %s619_s4 = int_to_ptr.vmem [resolvable:$false] %s618_s4 }
  0x2b   : > { %s620_s6 = scalar_lea.vmem %s619_s4, 1024  ;;  %p621_p2 = scmp.lt.s32.totalorder %s164_s24, %s619_s4 }
  0x2c   : > { %p616_p9 = pnand %p614_p8, %p602_p7  ;;  %p622_p6 = scmp.lt.s32.totalorder %s620_s6, %s613_s25 }
  0x2e   : > { %p617_p0 = pneg %p616_p9  ;;  %p623_p10 = por %p622_p6, %p621_p2 }
  0x30   : > { %p624_p11 = pnand %p623_p10, %p617_p0 }
  0x32   : > { %627 = shalt.err (!%p624_p11)
}
  0x33   : > { %s716_s5 = smov 64   ;;  %s717_s17 = smov 4  }
  0x34   : > { %503 = dma.hbm_to_vmem [thread:$0]  (!%p809_p4), %s162_s16, 512, %s164_s24, %s152_s30, %s716_s5, %s716_s5, %s717_s17  }
  0x35   : > { %175 = sbr.rel (%p800_p13) target bundleno = 590 (0x24e), region = 28  ;;  %s848_s29 = sand.u32 (!%p800_p13), 1, %s696_s10  }
  0x36   : > { %s458_s7 = sshll.u32 (!%p800_p13), %s848_s29, 5  ;;  %s178_s8 = scalar_lea.sflag (!%p800_p13), [#allocation5], %s848_s29 }
  0x37   : > { %s181_s15 = scalar_lea.vmem (!%p800_p13), [#allocation4], %s458_s7  ;;  %p918_p5 = scmp.ne.s32.totalorder (!%p800_p13), %s912_s20, 0 }
  0x3a   : > { %679 = dma.done.wait (%p918_p5), %s178_s8, 512  }
  0x3b   : > { %681 = vsyncadd (%p918_p5), %s178_s8, 4294966784 }
  0x3c   : > { %683 = dma.done.wait (%p775_p3), [#allocation8], 64  }
  0x3d   : > { %685 = vsyncadd (%p775_p3), [#allocation8], 4294967232  ;;  %v718_v0 = vmov 0.0   ;;  %vm719_vm0 = vmmov 0   ;;  %v568_v1 = vld [vmem:[%s181_s15 + $0x18] sm:$0xff]   ;;  %v569_v2 = vld [vmem:[%s181_s15 + $0x10] sm:$0xff]  }
  0x3e   : > { %476 = vmatprep.subr.bf16.mxu0 %v718_v0  ;;  %484 = vmatprep.mubr.msk.bf16.mxu0 %vm719_vm0, %v718_v0  ;;  %v570_v3 = vld [vmem:[%s181_s15 + $0x8] sm:$0xff]   ;;  %v571_v4 = vld [vmem:[%s181_s15] sm:$0xff]   ;;  %vm247_vm1 = vcmask 523264   ;;  %vm211_vm2 = vcmask 7168   ;;  %v720_v11 = vmov 0   ;;  %s460_s18 = sshll.u32 %s848_s29, 3 }
  0x3f   : > { %477 = vmatpush3.bf16.msra.mxu0 %v568_v1  ;;  %v214_v5 = vld [vmem:[#allocation7] sm:$0xf]  ;;  %212 = vst.msk [vmem:[#allocation2] sm:$0xff] %vm211_vm2, %v718_v0  ;;  %213 = vst.msk [vmem:[#allocation3] sm:$0xff] %vm211_vm2, %v718_v0  ;;  %566 = vset.pattern.permute.xlu1 %v720_v11  ;;  %s467_s20 = sshll.u32 %s704_s12, 7  ;;  %s205_s23 = scalar_lea.vmem [#allocation9], %s460_s18 }
  0x40   : > { %478 = vmatprep.subr.bf16.mxu0 %v718_v0  ;;  %567 = vset.pattern.permute.xlu0 %v720_v11  ;;  %s352_s26 = sshll.u32 %s205_s23, 4  ;;  %s350_s24 = scalar_lea.hbm %s907_s2, %s467_s20  ;;  %s353_s26 = int_to_ptr.vmem [resolvable:$true] %s352_s26 }
  0x41   : > { %s338_s30 = scalar_lea.sflag [#allocation6], %s848_s29  ;;  %s628_s25 = scalar_lea.vmem %s353_s26, 128 }
  0x42   : > { %p629_p3 = scmp.ne.s32.totalorder %s353_s26, %s628_s25  ;;  %p919_p13 = scmp.ne.s32.totalorder %s913_s21, 0 }
  0x43   : > { %479 = vmatpush3.bf16.msra.mxu0 %v569_v2  ;;  %s721_s3 = smov [#allocation9]  }
  0x44   : > { %480 = vmatprep.subr.bf16.mxu0 %v718_v0  ;;  %p630_p4 = pnand %p629_p3, %p919_p13  ;;  %s632_s4 = sshll.u32 %s721_s3, 4  ;;  %s633_s4 = int_to_ptr.vmem [resolvable:$false] %s632_s4 }
  0x45   : > { %s634_s12 = scalar_lea.vmem %s633_s4, 256  ;;  %p635_p12 = scmp.lt.s32.totalorder %s353_s26, %s633_s4 }
  0x46   : > { %v292_v12 = vld [vmem:[#allocation2] sm:$0xff]  ;;  %v298_v15 = vld [vmem:[#allocation3] sm:$0xff]  ;;  %p631_p1 = pneg %p630_p4  ;;  %p636_p7 = scmp.lt.s32.totalorder %s634_s12, %s628_s25 }
  0x47   : > { %481 = vmatpush3.bf16.msra.mxu0 %v570_v3 }
  0x48   : > { %482 = vmatprep.subr.bf16.mxu0 %v718_v0  ;;  %p637_p8 = por %p636_p7, %p635_p12 }
  0x4a   : > { %p638_p9 = pnand %p637_p8, %p631_p1 }
  0x4b   : > { %483 = vmatpush3.bf16.msra.mxu0 %v571_v4 }
  0x4e   : > { %485 = vmatmul.mubr.msk.bf16.vlgmr.msra.gmra.mxu0 %vm247_vm1, %v214_v5 }
 0x10e   : > { %v285_v6 = vpop.f32.mrf.mxu0 }
 0x10f   : > { %293 = vadd.xlane.f32.xlu0 %v285_v6  ;;  %v299_v8 = vmul.f32 %v285_v6, %v285_v6 }
 0x110   : > { %v486_v7 = vpop.f32.mrf.mxu0 }
 0x112   : > { %v288_v9 = vpop.f32.mrf.mxu0 }
 0x113   : > { %300 = vadd.xlane.f32.xlu0 %v299_v8 }
 0x114   : > { %v487_v10 = vpop.f32.mrf.mxu0 }
 0x198   : > { %v294_v13 = vpop.xlane.xlu0 %293 }
 0x199   : > { %v295_v14 = vadd.f32 %v294_v13, %v292_v12 }
 0x19b   : > { %297 = vst.msk [vmem:[#allocation2] sm:$0xff] %vm211_vm2, %v295_v14 }
 0x19c   : > { %v301_v16 = vpop.xlane.xlu0 %300 }
 0x19d   : > { %v302_v17 = vadd.f32 %v301_v16, %v298_v15 }
 0x19f   : > { %303 = vst.msk [vmem:[#allocation3] sm:$0xff] %vm211_vm2, %v302_v17 }
 0x1a2   : > { %v311_v18 = vld [vmem:[#allocation2] sm:$0xff] }
 0x1a3   : > { %v312_v19 = vmul.f32 0.015625, %v311_v18 }
 0x1a5   : > { %v315_v22 = vmul.f32 %v312_v19, %v312_v19  ;;  %v320_v27 = vsub.f32 0.0, %v312_v19 }
 0x1a6   : > { %v313_v20 = vld [vmem:[#allocation3] sm:$0xff] }
 0x1a7   : > { %v314_v21 = vmul.f32 0.015625, %v313_v20 }
 0x1a9   : > { %v316_v23 = vsub.f32 %v314_v21, %v315_v22 }
 0x1ab   : > { %v317_v24 = vmax.f32 %v316_v23, 0.0 }
 0x1ad   : > { %v318_v25 = vadd.f32 1e-05, %v317_v24 }
 0x1af   : > { %572 = vrsqrt.f32 %v318_v25 }
 0x1bc   : > { %v573_v26 = vpop.eup %572 }
 0x1bd   : > { %325 = vperm.xlu1 %566, %v573_v26   ;;  %v321_v28 = vmul.f32 %v573_v26, %v320_v27 }
 0x1c1   : > { %331 = vperm.xlu1 %566, %v321_v28  }
 0x238   : > { %v326_v29 = vpop.permute.xlu1 %325 }
 0x239   : > { %v328_v30 = vmul.f32 %v326_v29, %v285_v6 }
 0x23c   : > { %v332_v31 = vpop.permute.xlu1 %331 }
 0x23d   : > { %v334_v32 = vadd.f32 %v332_v31, %v328_v30 }
 0x23f   : > { %v335_v33 = vmax.f32 %v334_v32, 0.0 }
 0x241   : > { %336 = vst [vmem:[%s205_s23] sm:$0xff] %v335_v33 }
 0x242   : > { %641 = shalt.err (!%p638_p9)
}
 0x243   : > { %s642_s6 = scalar_lea.hbm %s350_s24, 128  ;;  %s646_s29 = scalar_lea.hbm %s907_s2, 256 }
 0x244   : > { %p643_p0 = scmp.ne.s32.totalorder %s350_s24, %s642_s6  ;;  %p647_p10 = scmp.lt.s32.totalorder %s350_s24, %s907_s2 }
 0x245   : > { %p648_p11 = scmp.lt.s32.totalorder %s646_s29, %s642_s6 }
 0x246   : > { %p644_p2 = pnand %p643_p0, %p919_p13 }
 0x247   : > { %p649_p5 = por %p648_p11, %p647_p10 }
 0x248   : > { %p645_p6 = pneg %p644_p2 }
 0x24a   : > { %p650_p3 = pnand %p649_p5, %p645_p6 }
 0x24c   : > { %653 = shalt.err (!%p650_p3)
}
 0x24d   : > { %494 = dma.vmem_to_hbm [thread:$0]  (%p919_p13), %s353_s26, 128, %s350_s24, %s338_s30  }
 0x24e PF: > { %s364_s15 = sand.u32 1, %s692_s9   ;;  %p920_p4 = scmp.ne.s32.totalorder %s914_s22, 0 }
 0x24f   : > { %p921_p1 = scmp.ge.s32.totalorder %s712_s14, 2  ;;  %s365_s18 = scalar_lea.sflag [#allocation6], %s364_s15 }
 0x251   : > { %p505_p12 = pnand %p921_p1, %p920_p4 }
 0x253   : > { %p506_p7 = pneg %p505_p12 }
 0x255   : > { %687 = dma.done.wait (%p506_p7), %s365_s18, 128  }
 0x256   : > { %689 = vsyncadd (%p506_p7), %s365_s18, 4294967168  ;;  %s19_s14 = sadd.s32 1, %s712_s14   ;;  %s922_s9 = smov %s696_s10 }
 0x257   : > { %p16_p8 = scmp.ge.s32.totalorder %s19_s14, 4   ;;  %s923_s10 = smov %s700_s11 }
 0x258   : > { %s924_s11 = smov %s839_s27  ;;  %s925_s12 = smov %s708_s13 }
 0x259   : > { %s926_s13 = smov %s928_s28  ;;  %18 = sbr.rel (!%p16_p8) target bundleno = 7 (0x7), region = 87 }
 0x25e   :  { %370 = vsyncpa [#allocation5], 1 }
 0x25f   :  { %372 = vsyncpa [#allocation5 + $0x1], 1 }
 0x260   :  { %373 = vsyncpa [#allocation8], 1 }
 0x261   :  { %374 = vsyncpa [#allocation6], 1 }
 0x262   :  { %376 = vsyncpa [#allocation6 + $0x1], 1 }

</bundles_post_ra>
